<compile_context>
chip_gen: v7x
topology: tpu7x:2x2x1
jax: 0.10.0
libtpu: 0.0.40
codegen_flags: <defaults>
</compile_context>

<pallas_src>
import functools

import jax
import jax.numpy as jnp
from jax.experimental import pallas as pl
from jax.experimental.pallas import tpu as pltpu


_LANES = 128
_NEG_INF = -1e30
_EPS = 1e-8  # matches torch.nn.CosineSimilarity default eps


def _round_up(x, m):
    return ((x + m - 1) // m) * m


def _contrastive_loss_kernel(
    x_ref, y_ref, inv_y_ref, mask_ref,       # inputs
    loss_ref,                                # output (per-row loss column)
    xn_scr, m_scr, l_scr, diag_scr,          # VMEM scratch, persist over ki
    *, temp: float, block_q: int, block_k: int, mask_cols: bool,
    mxu_dtype, mxu_precision,
):
    qi = pl.program_id(0)
    ki = pl.program_id(1)
    nk = pl.num_programs(1)

    # ---- once per q-tile: normalize queries (fold 1/temp), reset stats -----
    @pl.when(ki == 0)
    def _init():
        x = x_ref[...].astype(jnp.float32)                            # [TQ, D]
        inv_xn = jax.lax.rsqrt(
            jnp.maximum(jnp.sum(x * x, axis=-1, keepdims=True), _EPS * _EPS))
        xn_scr[...] = ((x * inv_xn) * (1.0 / temp)).astype(mxu_dtype)
        m_scr[...] = jnp.full_like(m_scr, _NEG_INF)
        l_scr[...] = jnp.zeros_like(l_scr)
        diag_scr[...] = jnp.zeros_like(diag_scr)

    # ---- per key tile: cheap rescale (norms precomputed in the wrapper) ----
    yn = y_ref[...].astype(jnp.float32) * inv_y_ref[...]               # [TK, D]

    # sim[i, j] = cos(x_i, y_j) / temp on the MXU; contract the feature dim of
    # both operands directly (no transpose).
    sim = jax.lax.dot_general(
        xn_scr[...], yn.astype(mxu_dtype),
        dimension_numbers=(((1,), (1,)), ((), ())),
        preferred_element_type=jnp.float32,
        precision=mxu_precision)                                       # [TQ, TK]

    if mask_cols:
        # Precomputed additive mask row: 0 for valid key columns, -1e30 for
        # padded ones (only the last key tile is non-zero).
        sim = sim + mask_ref[...]

    # ---- online logsumexp; row stats lane-replicated (pure VPU updates) ----
    m_prev = m_scr[...]                                                # [TQ, 128]
    m_next = jnp.maximum(m_prev, jnp.max(sim, axis=-1, keepdims=True))
    alpha = jnp.exp(m_prev - m_next)
    lanes = m_next.shape[-1]
    if block_k == lanes:
        m_b = m_next
    elif block_k < lanes:
        m_b = m_next[:, :block_k]
    else:
        m_b = jnp.tile(m_next, (1, block_k // lanes))
    p = jnp.exp(sim - m_b)                                             # [TQ, TK]
    l_scr[...] = alpha * l_scr[...] + jnp.sum(p, axis=-1, keepdims=True)
    m_scr[...] = m_next

    # ---- diagonal (label) term: rowwise dot over the slab of this q-tile
    # whose rows coincide with this key tile's columns (block_q % block_k == 0
    # guarantees the slab is fully contained and has static size block_k).
    q_start = qi * block_q
    k_start = ki * block_k

    @pl.when((k_start >= q_start) & (k_start < q_start + block_q))
    def _diag():
        off = pl.multiple_of(k_start - q_start, block_k)
        xs = xn_scr[pl.ds(off, block_k), :].astype(jnp.float32)        # [TK, D]
        d = jnp.sum(xs * yn, axis=-1, keepdims=True)                   # [TK, 1]
        diag_scr[pl.ds(off, block_k), :] = jnp.broadcast_to(
            d, (block_k, diag_scr.shape[-1]))

    # ---- finalize per-row losses once, at the last key step ----------------
    @pl.when(ki == nk - 1)
    def _finalize():
        m0 = m_scr[...][:, :1]
        l0 = l_scr[...][:, :1]
        d0 = diag_scr[...][:, :1]
        loss_ref[...] = m0 + jnp.log(l0) - d0


def contrastive_loss(emb1: jax.Array, emb2: jax.Array, temp: float = 0.5) -> jax.Array:
    """emb1, emb2: [B, D] float arrays. Returns scalar f32 loss (mean CE)."""
    assert emb1.shape == emb2.shape and emb1.ndim == 2
    B, D = emb1.shape
    d_pad = _round_up(D, _LANES)

    # Tile selection: TK lane/MXU aligned; TQ a multiple of TK (diag-slab
    # invariant).  Medium batches keep nq >= 2 (v7x has 2 TensorCores); large
    # batches grow TQ to cut the number of full key sweeps (HBM = nq*B*D).
    if B < 256:
        block_q = block_k = _round_up(B, 8)       # single tile each
    elif B < 512:
        block_q = block_k = 128                   # nq >= 2 for megacore
    elif B < 2048:
        block_q = block_k = 256
    else:
        block_q, block_k = 512, 256

    b_pad_q = _round_up(B, block_q)
    b_pad_k = _round_up(B, block_k)
    nq = b_pad_q // block_q
    nk = b_pad_k // block_k

    e1 = jnp.pad(emb1, ((0, b_pad_q - B), (0, d_pad - D)))
    e2 = jnp.pad(emb2, ((0, b_pad_k - B), (0, d_pad - D)))

    # Key-side inverse norms: computed once here (single pass over emb2)
    # instead of once per (qi, ki) grid step inside the kernel.  We do NOT
    # pre-scale the embeddings themselves.
    y32 = e2.astype(jnp.float32)
    inv_y = jax.lax.rsqrt(
        jnp.maximum(jnp.sum(y32 * y32, axis=-1, keepdims=True), _EPS * _EPS))

    # Additive column mask for padded keys (0 / -1e30); only the last key tile
    # is ever non-zero.  The last key tile always has >= 1 valid column, so
    # the online-softmax running sum can never be corrupted by a fully-masked
    # tile.
    mask_cols = b_pad_k != B
    col_mask = jnp.where(jnp.arange(b_pad_k) < B, 0.0, _NEG_INF
                         ).astype(jnp.float32).reshape(1, b_pad_k)

    # Explicit MXU precision: bf16 inputs -> native bf16 pass; f32 inputs ->
    # HIGHEST for parity with the f32 reference.
    if emb1.dtype == jnp.bfloat16:
        mxu_dtype, mxu_precision = jnp.bfloat16, None
    else:
        mxu_dtype, mxu_precision = jnp.float32, jax.lax.Precision.HIGHEST

    kernel = functools.partial(
        _contrastive_loss_kernel,
        temp=float(temp), block_q=block_q, block_k=block_k,
        mask_cols=mask_cols, mxu_dtype=mxu_dtype, mxu_precision=mxu_precision)

    in_item = jnp.dtype(emb1.dtype).itemsize
    mxu_item = jnp.dtype(mxu_dtype).itemsize
    vmem_est = (2 * block_q * d_pad * in_item        # emb1 tiles (2 buffers)
                + 2 * block_k * d_pad * in_item      # emb2 tiles (2 buffers)
                + 2 * block_k * _LANES * 4           # inv-norm tiles (lane pad)
                + 2 * 8 * block_k * 4                # mask tiles (sublane pad)
                + 2 * block_q * _LANES * 4           # output tiles (lane pad)
                + block_q * d_pad * mxu_item         # xn scratch
                + 3 * block_q * _LANES * 4)          # m / l / diag scratch
    vmem_limit = int(min(100 * 2 ** 20, max(32 * 2 ** 20, 2 * vmem_est)))

    row_losses = pl.pallas_call(
        kernel,
        out_shape=jax.ShapeDtypeStruct((b_pad_q, 1), jnp.float32),
        grid_spec=pltpu.PrefetchScalarGridSpec(
            num_scalar_prefetch=0,
            grid=(nq, nk),
            in_specs=[
                pl.BlockSpec((block_q, d_pad), lambda qi, ki: (qi, 0)),  # emb1
                pl.BlockSpec((block_k, d_pad), lambda qi, ki: (ki, 0)),  # emb2
                pl.BlockSpec((block_k, 1), lambda qi, ki: (ki, 0)),      # 1/||y||
                pl.BlockSpec((1, block_k), lambda qi, ki: (0, ki)),      # col mask
            ],
            out_specs=pl.BlockSpec((block_q, 1), lambda qi, ki: (qi, 0)),
            scratch_shapes=[
                pltpu.VMEM((block_q, d_pad), mxu_dtype),      # normalized q tile
                pltpu.VMEM((block_q, _LANES), jnp.float32),   # running max m
                pltpu.VMEM((block_q, _LANES), jnp.float32),   # running sum l
                pltpu.VMEM((block_q, _LANES), jnp.float32),   # diagonal term
            ],
        ),
        compiler_params=pltpu.CompilerParams(
            dimension_semantics=("parallel", "arbitrary"),
            vmem_limit_bytes=vmem_limit),
    )(e1, e2, inv_y, col_mask)

    # Tiny final reduction (drop padded rows) outside the kernel.
    return jnp.sum(row_losses[:B, 0]) / B


def _reference(emb1, emb2, temp=0.5):
    # Pure-JAX reference mirroring the PyTorch forward.
    eps = 1e-8
    xn = emb1 / jnp.maximum(jnp.linalg.norm(emb1, axis=-1, keepdims=True), eps)
    yn = emb2 / jnp.maximum(jnp.linalg.norm(emb2, axis=-1, keepdims=True), eps)
    sim = jnp.einsum("id,jd->ij", xn, yn, precision="highest") / temp
    b = sim.shape[0]
    logp = jax.nn.log_softmax(sim, axis=-1)
    return -jnp.mean(logp[jnp.arange(b), jnp.arange(b)])


if __name__ == "__main__":
    key = jax.random.PRNGKey(0)
    k1, k2 = jax.random.split(key)

    # Small shape consistent with [batch_size, dim] embeddings.
    B, D = 8, 32
    emb1 = jax.random.normal(k1, (B, D), dtype=jnp.float32)
    emb2 = jax.random.normal(k2, (B, D), dtype=jnp.float32)

    loss = contrastive_loss(emb1, emb2, temp=0.5)
    jax.block_until_ready(loss)
    ref = _reference(emb1, emb2, temp=0.5)
    assert jnp.allclose(loss, ref, atol=2e-5, rtol=2e-5), (loss, ref)

    # Multi-tile grid + padded-key masking + off-step-0 diagonal tiles.
    B2, D2 = 300, 64
    e1 = jax.random.normal(jax.random.PRNGKey(1), (B2, D2), dtype=jnp.float32)
    e2 = jax.random.normal(jax.random.PRNGKey(2), (B2, D2), dtype=jnp.float32)
    loss2 = contrastive_loss(e1, e2, temp=0.5)
    jax.block_until_ready(loss2)
    ref2 = _reference(e1, e2, temp=0.5)
    assert jnp.allclose(loss2, ref2, atol=1e-4, rtol=1e-4), (loss2, ref2)

    # Decoupled TQ(512)/TK(256) path with different q/k padding.
    B3, D3 = 2176, 96
    e1 = jax.random.normal(jax.random.PRNGKey(3), (B3, D3), dtype=jnp.float32)
    e2 = jax.random.normal(jax.random.PRNGKey(4), (B3, D3), dtype=jnp.float32)
    loss3 = contrastive_loss(e1, e2, temp=0.5)
    jax.block_until_ready(loss3)
    ref3 = _reference(e1, e2, temp=0.5)
    assert jnp.allclose(loss3, ref3, atol=1e-4, rtol=1e-4), (loss3, ref3)

    print("KERNEL_OK")
</pallas_src>

<mosaic_0001>
module attributes {stable_mosaic.version = 11 : i64} {
  func.func @_contrastive_loss_kernel(%arg0: i32, %arg1: i32, %arg2: memref<8x128xf32, #tpu.memory_space<vmem>>, %arg3: memref<8x128xf32, #tpu.memory_space<vmem>>, %arg4: memref<8x1xf32, #tpu.memory_space<vmem>>, %arg5: memref<1x8xf32, #tpu.memory_space<vmem>>, %arg6: memref<8x1xf32, #tpu.memory_space<vmem>>, %arg7: memref<8x128xf32, #tpu.memory_space<vmem>>, %arg8: memref<8x128xf32, #tpu.memory_space<vmem>>, %arg9: memref<8x128xf32, #tpu.memory_space<vmem>>, %arg10: memref<8x128xf32, #tpu.memory_space<vmem>>) attributes {dimension_semantics = [#tpu.dimension_semantics<parallel>, #tpu.dimension_semantics<arbitrary>], iteration_bounds = array<i64: 1, 1>, scalar_prefetch = 0 : i64, scratch_operands = 4 : i64, tpu.core_type = #tpu.core_type<tc>, window_params = [{transform_indices = @transform_0, window_bounds = array<i64: 8, 128>}, {transform_indices = @transform_1, window_bounds = array<i64: 8, 128>}, {transform_indices = @transform_2, window_bounds = array<i64: 8, 1>}, {transform_indices = @transform_3, window_bounds = array<i64: 1, 8>}, {transform_indices = @transform_4, window_bounds = array<i64: 8, 1>}]} {
    %c0_i32 = arith.constant 0 : i32
    %0 = arith.cmpi eq, %arg1, %c0_i32 : i32
    %1 = arith.extui %0 : i1 to i32
    %c0_i32_0 = arith.constant 0 : i32
    %2 = arith.cmpi ne, %1, %c0_i32_0 : i32
    scf.if %2 {
      %c0_21 = arith.constant 0 : index
      %c0_22 = arith.constant 0 : index
      %38 = vector.load %arg2[%c0_21, %c0_22] : memref<8x128xf32, #tpu.memory_space<vmem>>, vector<8x128xf32>
      %39 = arith.mulf %38, %38 : vector<8x128xf32>
      %cst_23 = arith.constant dense<0.000000e+00> : vector<8xf32>
      %40 = vector.multi_reduction <add>, %39, %cst_23 [1] : vector<8x128xf32> to vector<8xf32>
      %41 = vector.shape_cast %40 : vector<8xf32> to vector<8x1xf32>
      %cst_24 = arith.constant 1.000000e-16 : f32
      %42 = vector.broadcast %cst_24 : f32 to vector<8x1xf32>
      %43 = arith.maximumf %41, %42 : vector<8x1xf32>
      %44 = math.rsqrt %43 : vector<8x1xf32>
      %45 = vector.broadcast %44 : vector<8x1xf32> to vector<8x128xf32>
      %46 = arith.mulf %38, %45 : vector<8x128xf32>
      %cst_25 = arith.constant 2.000000e+00 : f32
      %47 = vector.broadcast %cst_25 : f32 to vector<8x128xf32>
      %48 = arith.mulf %46, %47 : vector<8x128xf32>
      %c0_26 = arith.constant 0 : index
      %c0_27 = arith.constant 0 : index
      %49 = vector.load %arg7[%c0_26, %c0_27] : memref<8x128xf32, #tpu.memory_space<vmem>>, vector<8x128xf32>
      tpu.vector_store %arg7[%c0_26, %c0_27], %48 {strides = array<i32>} : memref<8x128xf32, #tpu.memory_space<vmem>>, vector<8x128xf32>,
      %cst_28 = arith.constant -1.000000e+30 : f32
      %50 = vector.broadcast %cst_28 : f32 to vector<8x128xf32>
      %c0_29 = arith.constant 0 : index
      %c0_30 = arith.constant 0 : index
      %51 = vector.load %arg8[%c0_29, %c0_30] : memref<8x128xf32, #tpu.memory_space<vmem>>, vector<8x128xf32>
      tpu.vector_store %arg8[%c0_29, %c0_30], %50 {strides = array<i32>} : memref<8x128xf32, #tpu.memory_space<vmem>>, vector<8x128xf32>,
      %cst_31 = arith.constant 0.000000e+00 : f32
      %52 = vector.broadcast %cst_31 : f32 to vector<8x128xf32>
      %c0_32 = arith.constant 0 : index
      %c0_33 = arith.constant 0 : index
      %53 = vector.load %arg9[%c0_32, %c0_33] : memref<8x128xf32, #tpu.memory_space<vmem>>, vector<8x128xf32>
      tpu.vector_store %arg9[%c0_32, %c0_33], %52 {strides = array<i32>} : memref<8x128xf32, #tpu.memory_space<vmem>>, vector<8x128xf32>,
      %cst_34 = arith.constant 0.000000e+00 : f32
      %54 = vector.broadcast %cst_34 : f32 to vector<8x128xf32>
      %c0_35 = arith.constant 0 : index
      %c0_36 = arith.constant 0 : index
      %55 = vector.load %arg10[%c0_35, %c0_36] : memref<8x128xf32, #tpu.memory_space<vmem>>, vector<8x128xf32>
      tpu.vector_store %arg10[%c0_35, %c0_36], %54 {strides = array<i32>} : memref<8x128xf32, #tpu.memory_space<vmem>>, vector<8x128xf32>,
    } else {
    }
    %c0 = arith.constant 0 : index
    %c0_1 = arith.constant 0 : index
    %3 = vector.load %arg3[%c0, %c0_1] : memref<8x128xf32, #tpu.memory_space<vmem>>, vector<8x128xf32>
    %c0_2 = arith.constant 0 : index
    %c0_3 = arith.constant 0 : index
    %4 = vector.load %arg4[%c0_2, %c0_3] : memref<8x1xf32, #tpu.memory_space<vmem>>, vector<8x1xf32>
    %5 = vector.broadcast %4 : vector<8x1xf32> to vector<8x128xf32>
    %6 = arith.mulf %3, %5 : vector<8x128xf32>
    %c0_4 = arith.constant 0 : index
    %c0_5 = arith.constant 0 : index
    %7 = vector.load %arg7[%c0_4, %c0_5] : memref<8x128xf32, #tpu.memory_space<vmem>>, vector<8x128xf32>
    %cst = arith.constant dense<0.000000e+00> : vector<8x8xf32>
    %8 = tpu.matmul %7, %6, %cst {dimension_numbers = #tpu.dot_dimension_numbers<[1], [1], [0], [0], [0, 0, 1, 0], [], []>, precision = #tpu.contract_precision<fp32>} : vector<8x128xf32>, vector<8x128xf32>, vector<8x8xf32> -> vector<8x8xf32>
    %c0_6 = arith.constant 0 : index
    %c0_7 = arith.constant 0 : index
    %9 = vector.load %arg8[%c0_6, %c0_7] : memref<8x128xf32, #tpu.memory_space<vmem>>, vector<8x128xf32>
    %cst_8 = arith.constant dense<0xFF800000> : vector<8xf32>
    %10 = vector.multi_reduction <maximumf>, %8, %cst_8 [1] : vector<8x8xf32> to vector<8xf32>
    %11 = vector.shape_cast %10 : vector<8xf32> to vector<8x1xf32>
    %12 = vector.broadcast %11 : vector<8x1xf32> to vector<8x128xf32>
    %13 = arith.maximumf %9, %12 : vector<8x128xf32>
    %14 = arith.subf %9, %13 : vector<8x128xf32>
    %15 = math.exp %14 : vector<8x128xf32>
    %16 = vector.extract_strided_slice %13 {offsets = [0, 0], sizes = [8, 8], strides = [1, 1]} : vector<8x128xf32> to vector<8x8xf32>
    %17 = arith.subf %8, %16 : vector<8x8xf32>
    %18 = math.exp %17 : vector<8x8xf32>
    %c0_9 = arith.constant 0 : index
    %c0_10 = arith.constant 0 : index
    %19 = vector.load %arg9[%c0_9, %c0_10] : memref<8x128xf32, #tpu.memory_space<vmem>>, vector<8x128xf32>
    %20 = arith.mulf %15, %19 : vector<8x128xf32>
    %cst_11 = arith.constant dense<0.000000e+00> : vector<8xf32>
    %21 = vector.multi_reduction <add>, %18, %cst_11 [1] : vector<8x8xf32> to vector<8xf32>
    %22 = vector.shape_cast %21 : vector<8xf32> to vector<8x1xf32>
    %23 = vector.broadcast %22 : vector<8x1xf32> to vector<8x128xf32>
    %24 = arith.addf %20, %23 : vector<8x128xf32>
    %c0_12 = arith.constant 0 : index
    %c0_13 = arith.constant 0 : index
    %25 = vector.load %arg9[%c0_12, %c0_13] : memref<8x128xf32, #tpu.memory_space<vmem>>, vector<8x128xf32>
    tpu.vector_store %arg9[%c0_12, %c0_13], %24 {strides = array<i32>} : memref<8x128xf32, #tpu.memory_space<vmem>>, vector<8x128xf32>,
    %c0_14 = arith.constant 0 : index
    %c0_15 = arith.constant 0 : index
    %26 = vector.load %arg8[%c0_14, %c0_15] : memref<8x128xf32, #tpu.memory_space<vmem>>, vector<8x128xf32>
    tpu.vector_store %arg8[%c0_14, %c0_15], %13 {strides = array<i32>} : memref<8x128xf32, #tpu.memory_space<vmem>>, vector<8x128xf32>,
    %c8_i32 = arith.constant 8 : i32
    %27 = arith.muli %arg0, %c8_i32 : i32
    %c8_i32_16 = arith.constant 8 : i32
    %28 = arith.muli %arg1, %c8_i32_16 : i32
    %29 = arith.cmpi sge, %28, %27 : i32
    %c8_i32_17 = arith.constant 8 : i32
    %30 = arith.addi %27, %c8_i32_17 : i32
    %31 = arith.cmpi slt, %28, %30 : i32
    %32 = arith.andi %29, %31 : i1
    %33 = arith.extui %32 : i1 to i32
    %c0_i32_18 = arith.constant 0 : i32
    %34 = arith.cmpi ne, %33, %c0_i32_18 : i32
    scf.if %34 {
      %38 = arith.subi %28, %27 : i32
      %39 = tpu.assume_multiple %38, 8 : i32
      %40 = arith.index_cast %39 : i32 to index
      %c0_21 = arith.constant 0 : index
      %41 = vector.load %arg7[%40, %c0_21] : memref<8x128xf32, #tpu.memory_space<vmem>>, vector<8x128xf32>
      %42 = arith.mulf %41, %6 : vector<8x128xf32>
      %cst_22 = arith.constant dense<0.000000e+00> : vector<8xf32>
      %43 = vector.multi_reduction <add>, %42, %cst_22 [1] : vector<8x128xf32> to vector<8xf32>
      %44 = vector.shape_cast %43 : vector<8xf32> to vector<8x1xf32>
      %45 = vector.shape_cast %44 : vector<8x1xf32> to vector<8x1xf32>
      %46 = vector.broadcast %45 : vector<8x1xf32> to vector<8x128xf32>
      %47 = arith.index_cast %39 : i32 to index
      %c0_23 = arith.constant 0 : index
      %48 = vector.load %arg10[%47, %c0_23] : memref<8x128xf32, #tpu.memory_space<vmem>>, vector<8x128xf32>
      tpu.vector_store %arg10[%47, %c0_23], %46 {strides = array<i32>} : memref<8x128xf32, #tpu.memory_space<vmem>>, vector<8x128xf32>,
    } else {
    }
    %c0_i32_19 = arith.constant 0 : i32
    %35 = arith.cmpi eq, %arg1, %c0_i32_19 : i32
    %36 = arith.extui %35 : i1 to i32
    %c0_i32_20 = arith.constant 0 : i32
    %37 = arith.cmpi ne, %36, %c0_i32_20 : i32
    scf.if %37 {
      %c0_21 = arith.constant 0 : index
      %c0_22 = arith.constant 0 : index
      %38 = vector.load %arg8[%c0_21, %c0_22] : memref<8x128xf32, #tpu.memory_space<vmem>>, vector<8x128xf32>
      %39 = vector.extract_strided_slice %38 {offsets = [0, 0], sizes = [8, 1], strides = [1, 1]} : vector<8x128xf32> to vector<8x1xf32>
      %c0_23 = arith.constant 0 : index
      %c0_24 = arith.constant 0 : index
      %40 = vector.load %arg9[%c0_23, %c0_24] : memref<8x128xf32, #tpu.memory_space<vmem>>, vector<8x128xf32>
      %41 = vector.extract_strided_slice %40 {offsets = [0, 0], sizes = [8, 1], strides = [1, 1]} : vector<8x128xf32> to vector<8x1xf32>
      %c0_25 = arith.constant 0 : index
      %c0_26 = arith.constant 0 : index
      %42 = vector.load %arg10[%c0_25, %c0_26] : memref<8x128xf32, #tpu.memory_space<vmem>>, vector<8x128xf32>
      %43 = vector.extract_strided_slice %42 {offsets = [0, 0], sizes = [8, 1], strides = [1, 1]} : vector<8x128xf32> to vector<8x1xf32>
      %44 = math.log %41 : vector<8x1xf32>
      %45 = arith.addf %39, %44 : vector<8x1xf32>
      %46 = arith.subf %45, %43 : vector<8x1xf32>
      %c0_27 = arith.constant 0 : index
      %c0_28 = arith.constant 0 : index
      %47 = vector.load %arg6[%c0_27, %c0_28] : memref<8x1xf32, #tpu.memory_space<vmem>>, vector<8x1xf32>
      tpu.vector_store %arg6[%c0_27, %c0_28], %46 {strides = array<i32>} : memref<8x1xf32, #tpu.memory_space<vmem>>, vector<8x1xf32>,
    } else {
    }
    return
  }
  func.func @transform_0(%arg0: i32, %arg1: i32) -> (i32, i32) {
    %c0_i32 = arith.constant 0 : i32
    %c0_i32_0 = arith.constant 0 : i32
    return %arg0, %c0_i32 : i32, i32
  }
  func.func @transform_1(%arg0: i32, %arg1: i32) -> (i32, i32) {
    %c0_i32 = arith.constant 0 : i32
    %c0_i32_0 = arith.constant 0 : i32
    return %arg1, %c0_i32 : i32, i32
  }
  func.func @transform_2(%arg0: i32, %arg1: i32) -> (i32, i32) {
    %c0_i32 = arith.constant 0 : i32
    %c0_i32_0 = arith.constant 0 : i32
    return %arg1, %c0_i32 : i32, i32
  }
  func.func @transform_3(%arg0: i32, %arg1: i32) -> (i32, i32) {
    %c0_i32 = arith.constant 0 : i32
    %c0_i32_0 = arith.constant 0 : i32
    return %c0_i32, %arg1 : i32, i32
  }
  func.func @transform_4(%arg0: i32, %arg1: i32) -> (i32, i32) {
    %c0_i32 = arith.constant 0 : i32
    %c0_i32_0 = arith.constant 0 : i32
    return %arg0, %c0_i32 : i32, i32
  }
}

</mosaic_0001>

<bundles_post_ra>
// kernel: tpu_custom_call.1
= control target key start
LH: loop header
LB: loop body
LE: loop exit
PB: predicated region body
PF: predicated region fallthrough
CT: control target
= control target key end

     0   :  { %9 = vsyncpa [#allocation7], 0  ;;  %s644_s15 = smov [#allocation6]   ;;  %s700_s0 = inlined_call_operand.vmem [shape: f32[8,128], index: 0, kind: input, shape index: {}]   ;;  %s701_s1 = inlined_call_operand.hbm [shape: f32[8,128], index: 1, kind: input, shape index: {}]   ;;  %s702_s2 = inlined_call_operand.vmem [shape: f32[8,1], index: 2, kind: input, shape index: {}]   ;;  %s703_s3 = inlined_call_operand.vmem [shape: f32[1,8], index: 3, kind: input, shape index: {}]   ;;  %s704_s4 = inlined_call_operand.vmem [shape: f32[8,1], index: 4, kind: output, shape index: {}]  }
   0x1   :  { %s18_s16 = sshll.u32 %s644_s15, 4  ;;  %s620_s19 = scalar_lea.hbm %s701_s1, 128  ;;  %s19_s16 = int_to_ptr.vmem [resolvable:$true] %s18_s16 }
   0x2   :  { %p621_p0 = scmp.ne.s32.totalorder %s701_s1, %s620_s19  ;;  %p624_p1 = scmp.lt.u32.totalorder %s620_s19, %s701_s1 }
   0x4   :  { %p626_p2 = pnand %p624_p1, %p621_p0 }
   0x6   :  { %629 = shalt.err (!%p626_p2)
}
   0x7   :  { %s630_s3 = scalar_lea.vmem %s19_s16, 128  ;;  %p635_p4 = scmp.lt.s32.totalorder %s19_s16, %s19_s16 }
   0x8   :  { %p631_p3 = scmp.ne.s32.totalorder %s19_s16, %s630_s3  ;;  %p636_p5 = scmp.lt.s32.totalorder %s630_s3, %s630_s3 }
   0xa   :  { %p637_p6 = por %p636_p5, %p635_p4 }
   0xc   :  { %p638_p7 = pnand %p637_p6, %p631_p3 }
   0xe   :  { %641 = shalt.err (!%p638_p7)
}
   0xf   :  { %21 = dma.hbm_to_vmem [thread:$0]  %s701_s1, 128, %s19_s16, [#allocation7]  }
  0x10   :  { %642 = dma.done.wait [#allocation7], 128  }
  0x11   :  { %643 = vsyncadd [#allocation7], 4294967168  ;;  %v645_v0 = vmov 0   ;;  %v33_v1 = vld [vmem:[%s700_s0] sm:$0xff]  ;;  %v646_v4 = vmov 0.0   ;;  %vm647_vm0 = vmmov 0  }
  0x12   :  { %611 = vset.pattern.permute.xlu0 %v645_v0  ;;  %v34_v2 = vmul.f32 %v33_v1, %v33_v1  ;;  %v46_v3 = vld [vmem:[%s702_s2] sm:$0xff]  ;;  %568 = vmatprep.subr.mxu1 %v646_v4  ;;  %vm501_vm1 = vcmask 64512   ;;  %vm547_vm2 = vcmask 7168  }
  0x13   :  { %583 = vmatprep.subr.mxu0 %v646_v4  ;;  %585 = vmatprep.mubr.msk.f32.mxu0 %vm647_vm0, %v646_v4  ;;  %v45_v7 = vld [vmem:[#allocation6] sm:$0xff] }
  0x14   :  { %35 = vadd.xlane.f32.xlu0 %v34_v2  ;;  %570 = vmatprep.mubr.msk.f32.mxu1 %vm647_vm0, %v646_v4 }
  0x2a   :  { %49 = vperm.xlu0 %611, %v46_v3  }
  0xa1   :  { %v36_v5 = vpop.xlane.xlu0 %35 }
  0xa2   :  { %v37_v6 = vmax.f32 %v36_v5, 1e-16 }
  0xa4   :  { %612 = vrsqrt.f32 %v37_v6 }
  0xa9   :  { %v50_v8 = vpop.permute.xlu0 %49 }
  0xaa   :  { %v52_v9 = vmul.f32 %v50_v8, %v45_v7 }
  0xac   :  { %v55_v10 = vand.u32 4294901760, %v52_v9 }
  0xae   :  { %v613_v11 = vpop.eup %612  ;;  %v132_v12 = vsub.f32 %v52_v9, %v55_v10  ;;  %569 = vmatpush3.xpose.msra.mxu1 %v55_v10  ;;  %584 = vmatpush3.xpose.msra.mxu0 %v55_v10 }
  0xaf   :  { %v39_v13 = vmul.f32 %v613_v11, %v33_v1  ;;  %588 = vmatprep.subr.mxu0 %v646_v4  ;;  %573 = vmatprep.subr.mxu1 %v646_v4 }
  0xb0   :  { %v133_v15 = vand.u32 4294901760, %v132_v12 }
  0xb1   :  { %v40_v14 = vmul.f32 2.0, %v39_v13 }
  0xb2   :  { %v134_v19 = vsub.f32 %v132_v12, %v133_v15 }
  0xb3   :  { %v120_v16 = vand.u32 4294901760, %v40_v14  ;;  %v532_v17 = vmul.f32 %v52_v9, %v40_v14 }
  0xb4   :  { %v135_v22 = vand.u32 4294901760, %v134_v19 }
  0xb5   :  { %v121_v18 = vsub.f32 %v40_v14, %v120_v16 }
  0xb7   :  { %v122_v20 = vand.u32 4294901760, %v121_v18 }
  0xb9   :  { %586 = vmatmul.mubr.f32.vlgmr.msra.gmra.mrb[0].mxu0 %v122_v20  ;;  %v123_v21 = vsub.f32 %v121_v18, %v122_v20 }
  0xba   :  { %589 = vmatpush3.xpose.msra.mxu0 %v133_v15  ;;  %590 = vmatprep.mubr.msk.f32.mxu0 %vm647_vm0, %v646_v4 }
  0xbb   :  { %v124_v23 = vand.u32 4294901760, %v123_v21  ;;  %593 = vmatprep.subr.mxu0 %v646_v4 }
  0xbd   :  { %571 = vmatmul.mubr.f32.vlgmr.msra.gmra.mrb[0].mxu1 %v124_v23 }
  0xbe   :  { %574 = vmatpush3.xpose.msra.mxu1 %v135_v22  ;;  %575 = vmatprep.mubr.msk.f32.mxu1 %vm647_vm0, %v646_v4 }
  0xbf   :  { %578 = vmatprep.subr.mxu1 %v646_v4 }
  0xc1   :  { %591 = vmatmul.mubr.f32.vlgmr.msra.gmra.mrb[0].mxu0 %v120_v16 }
  0xc2   :  { %594 = vmatpush3.xpose.msra.mxu0 %v55_v10  ;;  %595 = vmatprep.mubr.msk.f32.mxu0 %vm647_vm0, %v646_v4 }
  0xc5   :  { %576 = vmatmul.mubr.f32.vlgmr.msra.gmra.mrb[0].mxu1 %v120_v16 }
  0xc6   :  { %579 = vmatpush3.xpose.msra.mxu1 %v132_v12  ;;  %580 = vmatprep.mubr.msk.f32.mxu1 %vm647_vm0, %v646_v4 }
  0xc9   :  { %596 = vmatmul.mubr.f32.vlgmr.msra.gmra.mrb[0].mxu0 %v120_v16 }
  0xcd   :  { %581 = vmatmul.mubr.f32.vlgmr.msra.gmra.mrb[0].mxu1 %v121_v18 }
 0x19c   :  { %v496_v24 = vpop.f32.mrb[0].mxu0 }
 0x19d   :  { %v597_v25 = vpop.f32.mrb[1].mxu0 }
 0x1a0   :  { %v276_v26 = vpop.f32.mrb[0].mxu1 }
 0x1a1   :  { %v598_v27 = vadd.f32 %v496_v24, %v276_v26  ;;  %v582_v28 = vpop.f32.mrb[1].mxu1 }
 0x1a3   :  { %v502_v29 = vsel %vm501_vm1, %v598_v27, -inf }
 0x1a4   :  { %503 = vmax.xlane.f32.xlu1 %v502_v29 }
 0x231   :  { %v504_v30 = vpop.xlane.xlu1 %503 }
 0x232   :  { %v505_v31 = vmax.f32 %v504_v30, -1e+30 }
 0x234   :  { %v509_v32 = vsub.f32 %v598_v27, %v505_v31  ;;  %v506_v36 = vsub.f32 -1e+30, %v505_v31 }
 0x236   :  { %v510_v33 = vmul.f32 1.442695, %v509_v32  ;;  %v507_v37 = vmul.f32 1.442695, %v506_v36 }
 0x238   :  { %614 = vpow2.f32 %v510_v33 }
 0x239   :  { %616 = vpow2.f32 %v507_v37 }
 0x242   :  { %v615_v34 = vpop.eup %614 }
 0x243   :  { %v514_v35 = vsel %vm501_vm1, %v615_v34, 0.0  ;;  %v617_v38 = vpop.eup %616 }
 0x244   :  { %515 = vadd.xlane.f32.xlu1 %v514_v35  ;;  %v513_v39 = vmul.f32 0.0, %v617_v38 }
 0x248   :  { %533 = vadd.xlane.f32.xlu1 %v532_v17 }
 0x2d1   :  { %v516_v40 = vpop.xlane.xlu1 %515 }
 0x2d2   :  { %v517_v41 = vadd.f32 %v516_v40, %v513_v39 }
 0x2d4   :  { %618 = vlog2.f32 %v517_v41 }
 0x2d5   :  { %v534_v45 = vpop.xlane.xlu1 %533 }
 0x2de   :  { %v619_v42 = vpop.eup %618 }
 0x2df   :  { %v544_v43 = vmul.f32 0.6931472, %v619_v42 }
 0x2e1   :  { %v545_v44 = vadd.f32 %v544_v43, %v505_v31 }
 0x2e3   :  { %v546_v46 = vsub.f32 %v545_v44, %v534_v45 }
 0x2e5   :  { %548 = vst.msk [vmem:[%s704_s4] sm:$0xff] %vm547_vm2, %v546_v46 }
 0x2e6   :  { %553 = vsyncpa [#allocation7], 1 }

</bundles_post_ra>
